<compile_context>
chip_gen: v7x
topology: tpu7x:2x2x1
jax: 0.10.0
libtpu: 0.0.40
codegen_flags: <defaults>
</compile_context>

<pallas_src>
import jax
import jax.numpy as jnp
from jax.experimental import pallas as pl
from jax.experimental.pallas import tpu as pltpu


def _round_up(x, m):
    return ((x + m - 1) // m) * m


def ffn_kernel(x_ref, w1_ref, b1_ref, w2_ref, b2_ref, o_ref, acc_ref):
    k = pl.program_id(1)

    @pl.when(k == 0)
    def _():
        acc_ref[...] = jnp.zeros_like(acc_ref)

    # fc1 partial: (tm, d) @ (d, th) -> f32; bias + ReLU in f32 on the VPU.
    h = jnp.dot(x_ref[...], w1_ref[...], preferred_element_type=jnp.float32)
    h = jnp.maximum(h + b1_ref[...], 0.0)

    # dropout: eval-mode identity (see TODO at top of file).
    # fc2 partial: (tm, th) @ (th, d), accumulated in f32 scratch.
    acc_ref[...] += jnp.dot(h.astype(w2_ref.dtype), w2_ref[...],
                            preferred_element_type=jnp.float32)

    @pl.when(k == pl.num_programs(1) - 1)
    def _():
        o_ref[...] = (acc_ref[...] + b2_ref[...]).astype(o_ref.dtype)


def feed_forward(x, w1, b1, w2, b2, *, tm=256, th=512,
                 compute_dtype=jnp.bfloat16):
    """FeedForward forward pass: fc2(relu(fc1(x))) (dropout = eval identity).

    x: (..., d_model); w1: (d_model, hidden); b1: (hidden,);
    w2: (hidden, d_model); b2: (d_model,). Returns x.shape / x.dtype.
    """
    orig_shape = x.shape
    d_model = x.shape[-1]
    hidden = w1.shape[1]
    x2 = x.reshape(-1, d_model)
    n = x2.shape[0]

    # ---- tiling / padding (128-lane alignment, 16-row bf16 sublanes) ----
    d_pad = _round_up(d_model, 128)              # lane-dense output stores
    th = min(th, _round_up(hidden, 128))         # hidden reduction tile
    h_pad = _round_up(hidden, th)
    tm = min(tm, _round_up(n, 16))               # row tile (multiple of 16)
    n_pad = _round_up(n, tm)

    xp = jnp.zeros((n_pad, d_pad), compute_dtype).at[:n, :d_model].set(
        x2.astype(compute_dtype))
    w1p = jnp.zeros((d_pad, h_pad), compute_dtype).at[:d_model, :hidden].set(
        w1.astype(compute_dtype))
    w2p = jnp.zeros((h_pad, d_pad), compute_dtype).at[:hidden, :d_model].set(
        w2.astype(compute_dtype))
    b1p = jnp.zeros((1, h_pad), jnp.float32).at[0, :hidden].set(
        b1.astype(jnp.float32))
    b2p = jnp.zeros((1, d_pad), jnp.float32).at[0, :d_model].set(
        b2.astype(jnp.float32))

    grid = (n_pad // tm, h_pad // th)

    itemsize = jnp.dtype(x.dtype).itemsize
    cost = pl.CostEstimate(
        flops=2 * n_pad * d_pad * h_pad * 2,       # two matmuls
        transcendentals=0,
        bytes_accessed=((xp.size + w1p.size + w2p.size) * 2
                        + (b1p.size + b2p.size) * 4
                        + n_pad * d_pad * itemsize))

    out = pl.pallas_call(
        ffn_kernel,
        out_shape=jax.ShapeDtypeStruct((n_pad, d_pad), x.dtype),
        grid_spec=pltpu.PrefetchScalarGridSpec(
            num_scalar_prefetch=0,
            grid=grid,
            in_specs=[
                pl.BlockSpec((tm, d_pad), lambda i, k: (i, 0)),   # x row tile
                pl.BlockSpec((d_pad, th), lambda i, k: (0, k)),   # w1 col tile
                pl.BlockSpec((1, th),     lambda i, k: (0, k)),   # b1 tile
                pl.BlockSpec((th, d_pad), lambda i, k: (k, 0)),   # w2 row tile
                pl.BlockSpec((1, d_pad),  lambda i, k: (0, 0)),   # b2 (full)
            ],
            out_specs=pl.BlockSpec((tm, d_pad), lambda i, k: (i, 0)),
            scratch_shapes=[pltpu.VMEM((tm, d_pad), jnp.float32)],
        ),
        compiler_params=pltpu.CompilerParams(
            dimension_semantics=("parallel", "arbitrary"),
            vmem_limit_bytes=64 * 1024 * 1024),
        cost_estimate=cost,
    )(xp, w1p, b1p, w2p, b2p)

    return out[:n, :d_model].reshape(orig_shape)


def _init_linear(key, fan_in, fan_out, dtype=jnp.float32):
    """Mirror nn.Linear's uniform(-1/sqrt(fan_in), 1/sqrt(fan_in)) init."""
    kw, kb = jax.random.split(key)
    bound = 1.0 / float(fan_in) ** 0.5
    w = jax.random.uniform(kw, (fan_in, fan_out), dtype, -bound, bound)
    b = jax.random.uniform(kb, (fan_out,), dtype, -bound, bound)
    return w, b


def _reference(x, w1, b1, w2, b2):
    """Pure-JAX reference with the same bf16-input / f32-accumulate numerics."""
    xb, w1b, w2b = (a.astype(jnp.bfloat16) for a in (x, w1, w2))
    h = jnp.dot(xb, w1b, preferred_element_type=jnp.float32) + b1
    h = jnp.maximum(h, 0.0)
    y = jnp.dot(h.astype(jnp.bfloat16), w2b,
                preferred_element_type=jnp.float32) + b2
    return y.astype(x.dtype)


if __name__ == "__main__":
    key = jax.random.PRNGKey(0)

    # (x_shape, d_model, hidden, tm, th)
    cases = [
        ((2, 8, 128), 128, 256, 256, 512),    # 128-aligned, single tile
        ((3, 5, 32), 32, 64, 256, 512),       # ragged shapes -> padding path
        ((4, 64, 128), 128, 512, 128, 256),   # multi-step grid (2 x 2)
    ]

    ok = True
    for idx, (xs, d_model, hidden, tm, th) in enumerate(cases):
        key, kx, k1, k2 = jax.random.split(key, 4)
        x = jax.random.normal(kx, xs, jnp.float32)
        w1, b1 = _init_linear(k1, d_model, hidden)
        w2, b2 = _init_linear(k2, hidden, d_model)

        out = feed_forward(x, w1, b1, w2, b2, tm=tm, th=th)
        jax.block_until_ready(out)

        ref = _reference(x, w1, b1, w2, b2)
        if not jnp.allclose(out, ref, atol=1e-2, rtol=1e-2):
            ok = False
            print(f"case {idx}: mismatch, max abs err = "
                  f"{float(jnp.max(jnp.abs(out - ref)))}")

    assert ok, "kernel output mismatch vs reference"
    print("KERNEL_OK")
</pallas_src>

<mosaic_0001>
module attributes {stable_mosaic.version = 11 : i64} {
  func.func @ffn_kernel(%arg0: i32, %arg1: i32, %arg2: memref<16x128xbf16, #tpu.memory_space<vmem>>, %arg3: memref<128x256xbf16, #tpu.memory_space<vmem>>, %arg4: memref<1x256xf32, #tpu.memory_space<vmem>>, %arg5: memref<256x128xbf16, #tpu.memory_space<vmem>>, %arg6: memref<1x128xf32, #tpu.memory_space<vmem>>, %arg7: memref<16x128xf32, #tpu.memory_space<vmem>>, %arg8: memref<16x128xf32, #tpu.memory_space<vmem>>) attributes {dimension_semantics = [#tpu.dimension_semantics<parallel>, #tpu.dimension_semantics<arbitrary>], iteration_bounds = array<i64: 1, 1>, scalar_prefetch = 0 : i64, scratch_operands = 1 : i64, tpu.core_type = #tpu.core_type<tc>, window_params = [{transform_indices = @transform_0, window_bounds = array<i64: 16, 128>}, {transform_indices = @transform_1, window_bounds = array<i64: 128, 256>}, {transform_indices = @transform_2, window_bounds = array<i64: 1, 256>}, {transform_indices = @transform_3, window_bounds = array<i64: 256, 128>}, {pipeline_mode = #tpu.pipeline_mode<synchronous>, transform_indices = @transform_4, window_bounds = array<i64: 1, 128>}, {transform_indices = @transform_5, window_bounds = array<i64: 16, 128>}]} {
    %c0_i32 = arith.constant 0 : i32
    %0 = arith.cmpi eq, %arg1, %c0_i32 : i32
    %1 = arith.extui %0 : i1 to i32
    %c0_i32_0 = arith.constant 0 : i32
    %2 = arith.cmpi ne, %1, %c0_i32_0 : i32
    scf.if %2 {
      %cst_16 = arith.constant 0.000000e+00 : f32
      %20 = vector.broadcast %cst_16 : f32 to vector<16x128xf32>
      %c0_17 = arith.constant 0 : index
      %c0_18 = arith.constant 0 : index
      %21 = vector.load %arg8[%c0_17, %c0_18] : memref<16x128xf32, #tpu.memory_space<vmem>>, vector<16x128xf32>
      tpu.vector_store %arg8[%c0_17, %c0_18], %20 {strides = array<i32>} : memref<16x128xf32, #tpu.memory_space<vmem>>, vector<16x128xf32>,
    } else {
    }
    %c0 = arith.constant 0 : index
    %c0_1 = arith.constant 0 : index
    %3 = vector.load %arg2[%c0, %c0_1] : memref<16x128xbf16, #tpu.memory_space<vmem>>, vector<16x128xbf16>
    %c0_2 = arith.constant 0 : index
    %c0_3 = arith.constant 0 : index
    %4 = vector.load %arg3[%c0_2, %c0_3] : memref<128x256xbf16, #tpu.memory_space<vmem>>, vector<128x256xbf16>
    %cst = arith.constant dense<0.000000e+00> : vector<16x256xf32>
    %5 = tpu.matmul %3, %4, %cst {dimension_numbers = #tpu.dot_dimension_numbers<[1], [0], [0], [1], [0, 0, 1, 1], [], []>} : vector<16x128xbf16>, vector<128x256xbf16>, vector<16x256xf32> -> vector<16x256xf32>
    %c0_4 = arith.constant 0 : index
    %c0_5 = arith.constant 0 : index
    %6 = vector.load %arg4[%c0_4, %c0_5] : memref<1x256xf32, #tpu.memory_space<vmem>>, vector<1x256xf32>
    %7 = vector.broadcast %6 : vector<1x256xf32> to vector<16x256xf32>
    %8 = arith.addf %5, %7 : vector<16x256xf32>
    %cst_6 = arith.constant 0.000000e+00 : f32
    %9 = vector.broadcast %cst_6 : f32 to vector<16x256xf32>
    %10 = arith.maximumf %8, %9 : vector<16x256xf32>
    %c0_7 = arith.constant 0 : index
    %c0_8 = arith.constant 0 : index
    %11 = vector.load %arg8[%c0_7, %c0_8] : memref<16x128xf32, #tpu.memory_space<vmem>>, vector<16x128xf32>
    %12 = arith.truncf %10 : vector<16x256xf32> to vector<16x256xbf16>
    %c0_9 = arith.constant 0 : index
    %c0_10 = arith.constant 0 : index
    %13 = vector.load %arg5[%c0_9, %c0_10] : memref<256x128xbf16, #tpu.memory_space<vmem>>, vector<256x128xbf16>
    %cst_11 = arith.constant dense<0.000000e+00> : vector<16x128xf32>
    %14 = tpu.matmul %12, %13, %cst_11 {dimension_numbers = #tpu.dot_dimension_numbers<[1], [0], [0], [1], [0, 0, 1, 1], [], []>} : vector<16x256xbf16>, vector<256x128xbf16>, vector<16x128xf32> -> vector<16x128xf32>
    %15 = arith.addf %11, %14 : vector<16x128xf32>
    %c0_12 = arith.constant 0 : index
    %c0_13 = arith.constant 0 : index
    %16 = vector.load %arg8[%c0_12, %c0_13] : memref<16x128xf32, #tpu.memory_space<vmem>>, vector<16x128xf32>
    tpu.vector_store %arg8[%c0_12, %c0_13], %15 {strides = array<i32>} : memref<16x128xf32, #tpu.memory_space<vmem>>, vector<16x128xf32>,
    %c0_i32_14 = arith.constant 0 : i32
    %17 = arith.cmpi eq, %arg1, %c0_i32_14 : i32
    %18 = arith.extui %17 : i1 to i32
    %c0_i32_15 = arith.constant 0 : i32
    %19 = arith.cmpi ne, %18, %c0_i32_15 : i32
    scf.if %19 {
      %c0_16 = arith.constant 0 : index
      %c0_17 = arith.constant 0 : index
      %20 = vector.load %arg8[%c0_16, %c0_17] : memref<16x128xf32, #tpu.memory_space<vmem>>, vector<16x128xf32>
      %c0_18 = arith.constant 0 : index
      %c0_19 = arith.constant 0 : index
      %21 = vector.load %arg6[%c0_18, %c0_19] : memref<1x128xf32, #tpu.memory_space<vmem>>, vector<1x128xf32>
      %22 = vector.broadcast %21 : vector<1x128xf32> to vector<16x128xf32>
      %23 = arith.addf %20, %22 : vector<16x128xf32>
      %c0_20 = arith.constant 0 : index
      %c0_21 = arith.constant 0 : index
      %24 = vector.load %arg7[%c0_20, %c0_21] : memref<16x128xf32, #tpu.memory_space<vmem>>, vector<16x128xf32>
      tpu.vector_store %arg7[%c0_20, %c0_21], %23 {strides = array<i32>} : memref<16x128xf32, #tpu.memory_space<vmem>>, vector<16x128xf32>,
    } else {
    }
    return
  }
  func.func @transform_0(%arg0: i32, %arg1: i32) -> (i32, i32) {
    %c0_i32 = arith.constant 0 : i32
    %c0_i32_0 = arith.constant 0 : i32
    return %arg0, %c0_i32 : i32, i32
  }
  func.func @transform_1(%arg0: i32, %arg1: i32) -> (i32, i32) {
    %c0_i32 = arith.constant 0 : i32
    %c0_i32_0 = arith.constant 0 : i32
    return %c0_i32, %arg1 : i32, i32
  }
  func.func @transform_2(%arg0: i32, %arg1: i32) -> (i32, i32) {
    %c0_i32 = arith.constant 0 : i32
    %c0_i32_0 = arith.constant 0 : i32
    return %c0_i32, %arg1 : i32, i32
  }
  func.func @transform_3(%arg0: i32, %arg1: i32) -> (i32, i32) {
    %c0_i32 = arith.constant 0 : i32
    %c0_i32_0 = arith.constant 0 : i32
    return %arg1, %c0_i32 : i32, i32
  }
  func.func @transform_4(%arg0: i32, %arg1: i32) -> (i32, i32) {
    %c0_i32 = arith.constant 0 : i32
    %c0_i32_0 = arith.constant 0 : i32
    %c0_i32_1 = arith.constant 0 : i32
    return %c0_i32, %c0_i32_0 : i32, i32
  }
  func.func @transform_5(%arg0: i32, %arg1: i32) -> (i32, i32) {
    %c0_i32 = arith.constant 0 : i32
    %c0_i32_0 = arith.constant 0 : i32
    return %arg0, %c0_i32 : i32, i32
  }
}

</mosaic_0001>

<bundles_post_ra>
// kernel: tpu_custom_call.1
= control target key start
LH: loop header
LB: loop body
LE: loop exit
PB: predicated region body
PF: predicated region fallthrough
CT: control target
= control target key end

     0   :  { %10 = vsyncpa [#allocation4], 0  ;;  %s834_s0 = inlined_call_operand.hbm [shape: bf16[16,128], index: 0, kind: input, shape index: {}]   ;;  %s835_s1 = inlined_call_operand.hbm [shape: bf16[128,256], index: 1, kind: input, shape index: {}]   ;;  %s836_s2 = inlined_call_operand.hbm [shape: f32[1,256], index: 2, kind: input, shape index: {}]   ;;  %s837_s3 = inlined_call_operand.hbm [shape: bf16[256,128], index: 3, kind: input, shape index: {}]   ;;  %s838_s4 = inlined_call_operand.hbm [shape: f32[1,128], index: 4, kind: input, shape index: {}]   ;;  %s839_s5 = inlined_call_operand.hbm [shape: f32[16,128], index: 5, kind: output, shape index: {}]  }
   0x1   :  { %11 = vsyncpa [#allocation7], 0 }
   0x2   :  { %12 = vsyncpa [#allocation10], 0 }
   0x3   :  { %13 = vsyncpa [#allocation5], 0  ;;  %s715_s18 = smov [#allocation6]   ;;  %s575_s22 = scalar_lea.hbm %s835_s1, 2048 }
   0x4   :  { %s31_s19 = sshll.u32 %s715_s18, 4  ;;  %p576_p0 = scmp.ne.s32.totalorder %s835_s1, %s575_s22  ;;  %s32_s19 = int_to_ptr.vmem [resolvable:$true] %s31_s19 }
   0x5   :  { %p579_p1 = scmp.lt.u32.totalorder %s575_s22, %s835_s1 }
   0x7   :  { %p581_p2 = pnand %p579_p1, %p576_p0 }
   0x9   :  { %584 = shalt.err (!%p581_p2)
}
   0xa   :  { %s585_s27 = scalar_lea.vmem %s32_s19, 2048  ;;  %p590_p4 = scmp.lt.s32.totalorder %s32_s19, %s32_s19 }
   0xb   :  { %p586_p3 = scmp.ne.s32.totalorder %s32_s19, %s585_s27  ;;  %p591_p5 = scmp.lt.s32.totalorder %s585_s27, %s585_s27 }
   0xd   :  { %p592_p6 = por %p591_p5, %p590_p4 }
   0xf   :  { %p593_p7 = pnand %p592_p6, %p586_p3 }
  0x11   :  { %596 = shalt.err (!%p593_p7)
}
  0x12   :  { %s716_s28 = smov 128   ;;  %s717_s29 = smov 8  }
  0x13   :  { %37 = dma.hbm_to_vmem [thread:$0]  %s835_s1, 2048, %s32_s19, [#allocation7], %s716_s28, %s716_s28, %s717_s29  }
  0x14   :  { %s718_s7 = smov [#allocation9]   ;;  %s719_s9 = smov [#allocation3]  }
  0x15   :  { %s53_s8 = sshll.u32 %s718_s7, 4  ;;  %s19_s10 = sshll.u32 %s719_s9, 4  ;;  %s54_s8 = int_to_ptr.vmem [resolvable:$true] %s53_s8  ;;  %s20_s10 = int_to_ptr.vmem [resolvable:$true] %s19_s10 }
  0x16   :  { %s597_s13 = scalar_lea.hbm %s837_s3, 2048 }
  0x17   :  { %p598_p8 = scmp.ne.s32.totalorder %s837_s3, %s597_s13  ;;  %p601_p9 = scmp.lt.u32.totalorder %s597_s13, %s837_s3 }
  0x19   :  { %p603_p10 = pnand %p601_p9, %p598_p8 }
  0x1b   :  { %606 = shalt.err (!%p603_p10)
}
  0x1c   :  { %s607_s1 = scalar_lea.vmem %s54_s8, 2048  ;;  %p612_p12 = scmp.lt.s32.totalorder %s54_s8, %s54_s8 }
  0x1d   :  { %p608_p11 = scmp.ne.s32.totalorder %s54_s8, %s607_s1  ;;  %p613_p13 = scmp.lt.s32.totalorder %s607_s1, %s607_s1 }
  0x1f   :  { %p614_p0 = por %p613_p13, %p612_p12 }
  0x21   :  { %p615_p1 = pnand %p614_p0, %p608_p11 }
  0x23   :  { %618 = shalt.err (!%p615_p1)
}
  0x24   :  { %s720_s18 = smov 64   ;;  %s721_s19 = smov 4  }
  0x25   :  { %59 = dma.hbm_to_vmem [thread:$0]  %s837_s3, 2048, %s54_s8, [#allocation10], %s720_s18, %s720_s18, %s721_s19  }
  0x26   :  { %s619_s24 = scalar_lea.hbm %s834_s0, 128 }
  0x27   :  { %p620_p2 = scmp.ne.s32.totalorder %s834_s0, %s619_s24  ;;  %p623_p3 = scmp.lt.u32.totalorder %s619_s24, %s834_s0 }
  0x29   :  { %p625_p4 = pnand %p623_p3, %p620_p2 }
  0x2b   :  { %628 = shalt.err (!%p625_p4)
}
  0x2c   :  { %s629_s6 = scalar_lea.vmem %s20_s10, 128  ;;  %p634_p6 = scmp.lt.s32.totalorder %s20_s10, %s20_s10 }
  0x2d   :  { %p630_p5 = scmp.ne.s32.totalorder %s20_s10, %s629_s6  ;;  %p635_p7 = scmp.lt.s32.totalorder %s629_s6, %s629_s6 }
  0x2f   :  { %p636_p8 = por %p635_p7, %p634_p6 }
  0x31   :  { %p637_p9 = pnand %p636_p8, %p630_p5 }
  0x33   :  { %640 = shalt.err (!%p637_p9)
}
  0x34   :  { %25 = dma.hbm_to_vmem [thread:$0]  %s834_s0, 128, %s20_s10, [#allocation4], %s720_s18, %s720_s18, %s721_s19  }
  0x35   :  { %s722_s8 = smov [#allocation8]   ;;  %s723_s11 = smov [#allocation11]  }
  0x36   :  { %s44_s9 = sshll.u32 %s722_s8, 4  ;;  %s66_s12 = sshll.u32 %s723_s11, 4  ;;  %s45_s9 = int_to_ptr.vmem [resolvable:$true] %s44_s9  ;;  %s67_s12 = int_to_ptr.vmem [resolvable:$true] %s66_s12 }
  0x37   :  { %s641_s15 = scalar_lea.hbm %s836_s2, 32 }
  0x38   :  { %p642_p10 = scmp.ne.s32.totalorder %s836_s2, %s641_s15  ;;  %p645_p11 = scmp.lt.u32.totalorder %s641_s15, %s836_s2 }
  0x3a   :  { %p647_p12 = pnand %p645_p11, %p642_p10 }
  0x3c   :  { %650 = shalt.err (!%p647_p12)
}
  0x3d   :  { %s651_s0 = scalar_lea.vmem %s45_s9, 32  ;;  %p656_p0 = scmp.lt.s32.totalorder %s45_s9, %s45_s9 }
  0x3e   :  { %p652_p13 = scmp.ne.s32.totalorder %s45_s9, %s651_s0  ;;  %p657_p1 = scmp.lt.s32.totalorder %s651_s0, %s651_s0 }
  0x40   :  { %p658_p2 = por %p657_p1, %p656_p0 }
  0x42   :  { %p659_p3 = pnand %p658_p2, %p652_p13 }
  0x44   :  { %662 = shalt.err (!%p659_p3)
}
  0x45   :  { %47 = dma.hbm_to_vmem [thread:$0]  %s836_s2, 32, %s45_s9, [#allocation7]  }
  0x46   :  { %s663_s22 = scalar_lea.hbm %s838_s4, 16 }
  0x47   :  { %p664_p4 = scmp.ne.s32.totalorder %s838_s4, %s663_s22  ;;  %p667_p5 = scmp.lt.u32.totalorder %s663_s22, %s838_s4 }
  0x49   :  { %p669_p6 = pnand %p667_p5, %p664_p4 }
  0x4b   :  { %672 = shalt.err (!%p669_p6)
}
  0x4c   :  { %s673_s27 = scalar_lea.vmem %s67_s12, 16  ;;  %s677_s30 = scalar_lea.vmem %s67_s12, 32 }
  0x4d   :  { %p674_p7 = scmp.ne.s32.totalorder %s67_s12, %s673_s27  ;;  %p678_p8 = scmp.lt.s32.totalorder %s67_s12, %s67_s12 }
  0x4e   :  { %p679_p9 = scmp.lt.s32.totalorder %s677_s30, %s673_s27 }
  0x50   :  { %p680_p10 = por %p679_p9, %p678_p8 }
  0x52   :  { %p681_p11 = pnand %p680_p10, %p674_p7 }
  0x54   :  { %684 = shalt.err (!%p681_p11)
}
  0x55   :  { %69 = dma.hbm_to_vmem [thread:$0]  %s838_s4, 16, %s67_s12, [#allocation10]  }
  0x56   :  { %707 = dma.done.wait [#allocation4], 128  }
  0x57   :  { %708 = vsyncadd [#allocation4], 4294967168 }
  0x58   :  { %709 = dma.done.wait [#allocation7], 2080  }
  0x59   :  { %710 = vsyncadd [#allocation7], 4294965216 }
  0x5a   :  { %711 = dma.done.wait [#allocation10], 2064  }
  0x5b   :  { %712 = vsyncadd [#allocation10], 4294965232  ;;  %v724_v0 = vmov 0   ;;  %v534_v1 = vld [vmem:[#allocation6 + $0x4] ss:$8 sps:$4 sm:$0xff]   ;;  %v563_v16 = vld [vmem:[#allocation9 + $0x50] sm:$0xff]   ;;  %v112_v34 = vlaneseq }
  0x5c   :  { %240 = vmatprep.mubr.bf16.mxu0 %v724_v0  ;;  %v536_v2 = vld [vmem:[#allocation6] ss:$8 sps:$4 sm:$0xff]   ;;  %208 = vmatprep.subr.bf16.mxu0 %v534_v1  ;;  %v537_v3 = vld [vmem:[#allocation6 + $0x14] ss:$8 sps:$4 sm:$0xff]   ;;  %v539_v4 = vld [vmem:[#allocation6 + $0x10] ss:$8 sps:$4 sm:$0xff]  }
  0x5d   :  { %209 = vmatpush1.bf16.msra.mxu0 %v536_v2  ;;  %v540_v5 = vld [vmem:[#allocation6 + $0x24] ss:$8 sps:$4 sm:$0xff]   ;;  %v542_v6 = vld [vmem:[#allocation6 + $0x20] ss:$8 sps:$4 sm:$0xff]   ;;  %v543_v7 = vld [vmem:[#allocation6 + $0x34] ss:$8 sps:$4 sm:$0xff]  }
  0x5e   :  { %210 = vmatprep.subr.bf16.mxu0 %v537_v3  ;;  %v545_v8 = vld [vmem:[#allocation6 + $0x30] ss:$8 sps:$4 sm:$0xff]   ;;  %v546_v9 = vld [vmem:[#allocation6 + $0x44] ss:$8 sps:$4 sm:$0xff]   ;;  %v548_v11 = vld [vmem:[#allocation6 + $0x40] ss:$8 sps:$4 sm:$0xff]  }
  0x5f   :  { %v559_v10 = vld [vmem:[#allocation9 + $0x40] sm:$0xff]   ;;  %v549_v13 = vld [vmem:[#allocation6 + $0x54] ss:$8 sps:$4 sm:$0xff]   ;;  %v561_v14 = vld [vmem:[#allocation9 + $0x48] sm:$0xff]   ;;  %v113_v35 = vshrl.u32 %v112_v34, 7  ;;  %s725_s4 = smov [#allocation12]  }
  0x60   :  { %v560_v12 = vld [vmem:[#allocation9] sm:$0xff]   ;;  %501 = vmatprep.subr.bf16.mxu1 %v559_v10  ;;  %v562_v15 = vld [vmem:[#allocation9 + $0x8] sm:$0xff]   ;;  %v564_v19 = vld [vmem:[#allocation9 + $0x10] sm:$0xff]   ;;  %s453_s3 = sshll.u32 %s725_s4, 4  ;;  %s454_s3 = int_to_ptr.vmem [resolvable:$true] %s453_s3 }
  0x61   :  { %211 = vmatpush1.bf16.msra.mxu0 %v539_v4  ;;  %502 = vmatpush3.bf16.msra.mxu1 %v560_v12  ;;  %v551_v17 = vld [vmem:[#allocation6 + $0x50] ss:$8 sps:$4 sm:$0xff]   ;;  %v552_v18 = vld [vmem:[#allocation6 + $0x64] ss:$8 sps:$4 sm:$0xff]   ;;  %v554_v21 = vld [vmem:[#allocation6 + $0x60] ss:$8 sps:$4 sm:$0xff]   ;;  %p690_p13 = scmp.lt.s32.totalorder %s454_s3, %s454_s3 }
  0x62   :  { %212 = vmatprep.subr.bf16.mxu0 %v540_v5  ;;  %503 = vmatprep.subr.bf16.mxu1 %v561_v14  ;;  %v565_v20 = vld [vmem:[#allocation9 + $0x58] sm:$0xff]   ;;  %v567_v24 = vld [vmem:[#allocation9 + $0x60] sm:$0xff]   ;;  %v569_v27 = vld [vmem:[#allocation9 + $0x68] sm:$0xff]   ;;  %v114_v36 = vsub.s32 0, %v113_v35  ;;  %v118_v38 = vsub.s32 1, %v113_v35  ;;  %s685_s7 = scalar_lea.vmem %s454_s3, 256 }
  0x63   :  { %v555_v22 = vld [vmem:[#allocation6 + $0x74] ss:$8 sps:$4 sm:$0xff]   ;;  %v557_v25 = vld [vmem:[#allocation6 + $0x70] ss:$8 sps:$4 sm:$0xff]   ;;  %v568_v26 = vld [vmem:[#allocation9 + $0x20] sm:$0xff]   ;;  %p686_p12 = scmp.ne.s32.totalorder %s454_s3, %s685_s7  ;;  %p691_p0 = scmp.lt.s32.totalorder %s685_s7, %s685_s7 }
  0x64   :  { %v566_v23 = vld [vmem:[#allocation9 + $0x18] sm:$0xff]   ;;  %v570_v29 = vld [vmem:[#allocation9 + $0x28] sm:$0xff]   ;;  %v571_v30 = vld [vmem:[#allocation9 + $0x70] sm:$0xff]  }
  0x65   :  { %213 = vmatpush1.bf16.msra.mxu0 %v542_v6  ;;  %504 = vmatpush3.bf16.msra.mxu1 %v562_v15  ;;  %v558_v28 = vld [vmem:[#allocation3] sm:$0xff]   ;;  %v110_v37 = vld [vmem:[#allocation8] sm:$0x3]  ;;  %v500_v57 = vld [vmem:[#allocation11] ss:$0 sm:$0xff]  ;;  %p692_p1 = por %p691_p0, %p690_p13 }
  0x66   :  { %214 = vmatprep.subr.bf16.mxu0 %v543_v7  ;;  %505 = vmatprep.subr.bf16.mxu1 %v563_v16  ;;  %v572_v31 = vld [vmem:[#allocation9 + $0x30] sm:$0xff]   ;;  %v573_v32 = vld [vmem:[#allocation9 + $0x78] sm:$0xff]   ;;  %v115_v39 = vrot.slane %v110_v37, %v114_v36  ;;  %v119_v40 = vrot.slane %v110_v37, %v118_v38 }
  0x67   :  { %v574_v33 = vld [vmem:[#allocation9 + $0x38] sm:$0xff]   ;;  %p693_p2 = pnand %p692_p1, %p686_p12 }
  0x69   :  { %215 = vmatpush1.bf16.msra.mxu0 %v545_v8  ;;  %506 = vmatpush3.bf16.msra.mxu1 %v564_v19 }
  0x6a   :  { %216 = vmatprep.subr.bf16.mxu0 %v546_v9  ;;  %507 = vmatprep.subr.bf16.mxu1 %v565_v20 }
  0x6d   :  { %217 = vmatpush1.bf16.msra.mxu0 %v548_v11  ;;  %508 = vmatpush3.bf16.msra.mxu1 %v566_v23 }
  0x6e   :  { %218 = vmatprep.subr.bf16.mxu0 %v549_v13  ;;  %509 = vmatprep.subr.bf16.mxu1 %v567_v24 }
  0x71   :  { %219 = vmatpush1.bf16.msra.mxu0 %v551_v17  ;;  %510 = vmatpush3.bf16.msra.mxu1 %v568_v26 }
  0x72   :  { %220 = vmatprep.subr.bf16.mxu0 %v552_v18  ;;  %511 = vmatprep.subr.bf16.mxu1 %v569_v27 }
  0x75   :  { %221 = vmatpush1.bf16.msra.mxu0 %v554_v21  ;;  %512 = vmatpush3.bf16.msra.mxu1 %v570_v29 }
  0x76   :  { %222 = vmatprep.subr.bf16.mxu0 %v555_v22  ;;  %513 = vmatprep.subr.bf16.mxu1 %v571_v30 }
  0x79   :  { %223 = vmatpush1.bf16.msra.mxu0 %v557_v25  ;;  %514 = vmatpush3.bf16.msra.mxu1 %v572_v31 }
  0x7a   :  { %515 = vmatprep.subr.bf16.mxu1 %v573_v32 }
  0x7c   :  { %241 = vmatmul.mubr.bf16.vlgmr.msra.gmra.mrb[0].mxu0 %v558_v28 }
  0x7d   :  { %516 = vmatpush3.bf16.msra.mxu1 %v574_v33 }
 0x14f   :  { %v242_v41 = vpop.f32.mrb[0].mxu0 }
 0x150   :  { %v243_v42 = vadd.f32 %v242_v41, %v115_v39  ;;  %v244_v43 = vpop.f32.mrb[1].mxu0 }
 0x151   :  { %v245_v44 = vadd.f32 %v244_v43, %v119_v40  ;;  %v246_v45 = vpop.f32.mrb[2].mxu0 }
 0x152   :  { %v247_v46 = vadd.f32 %v246_v45, %v115_v39  ;;  %v248_v47 = vpop.f32.mrb[3].mxu0  ;;  %v251_v49 = vmax.f32 %v243_v42, 0.0 }
 0x153   :  { %v249_v48 = vadd.f32 %v248_v47, %v119_v40  ;;  %v252_v51 = vmax.f32 %v245_v44, 0.0 }
 0x154   :  { %v253_v50 = vmax.f32 %v247_v46, 0.0 }
 0x155   :  { %v254_v52 = vmax.f32 %v249_v48, 0.0 }
 0x156   :  { %v257_v53 = vpack.c.bf16 %v253_v50, %v251_v49 }
 0x157   :  { %v258_v54 = vpack.c.bf16 %v254_v52, %v252_v51 }
 0x159   :  { %419 = vmatprep.mubr.bf16.mxu1 %v258_v54 }
 0x15a   :  { %420 = vmatmul.mubr.bf16.vlgmr.msra.gmra.mrb[0].mxu1 %v257_v53 }
 0x22d   :  { %v517_v55 = vpop.f32.mrb[0].mxu1 }
 0x22e   :  { %v518_v56 = vpop.f32.mrb[1].mxu1 }
 0x22f   :  { %v519_v58 = vadd.f32 %v518_v56, %v517_v55  ;;  %v520_v59 = vpop.f32.mrb[2].mxu1 }
 0x230   :  { %v521_v60 = vpop.f32.mrb[3].mxu1 }
 0x231   :  { %v444_v61 = vadd.f32 %v519_v58, %v500_v57  ;;  %v522_v62 = vadd.f32 %v521_v60, %v520_v59 }
 0x233   :  { %446 = vst [vmem:[#allocation12] sm:$0xff] %v444_v61  ;;  %v445_v63 = vadd.f32 %v522_v62, %v500_v57 }
 0x235   :  { %447 = vst [vmem:[#allocation12 + $0x8] sm:$0xff] %v445_v63 }
 0x236   :  { %696 = shalt.err (!%p693_p2)
}
 0x237   :  { %s697_s11 = scalar_lea.hbm %s839_s5, 256 }
 0x238   :  { %p698_p3 = scmp.ne.s32.totalorder %s839_s5, %s697_s11  ;;  %p701_p4 = scmp.lt.u32.totalorder %s697_s11, %s839_s5 }
 0x23a   :  { %p703_p5 = pnand %p701_p4, %p698_p3 }
 0x23c   :  { %706 = shalt.err (!%p703_p5)
}
 0x23d   :  { %459 = dma.vmem_to_hbm [thread:$0]  %s454_s3, 256, %s839_s5, [#allocation5], %s716_s28, %s716_s28, %s717_s29  }
 0x23e   :  { %713 = dma.done.wait [#allocation5], 256  }
 0x23f   :  { %714 = vsyncadd [#allocation5], 4294967040 }
 0x240   :  { %463 = vsyncpa [#allocation4], 1 }
 0x241   :  { %464 = vsyncpa [#allocation7], 1 }
 0x242   :  { %465 = vsyncpa [#allocation10], 1 }
 0x243   :  { %466 = vsyncpa [#allocation5], 1 }

</bundles_post_ra>
